<compile_context>
chip_gen: v7x
topology: tpu7x:2x2x1
jax: 0.10.0
libtpu: 0.0.40
codegen_flags: <defaults>
</compile_context>

<pallas_src>
import functools

import jax
import jax.numpy as jnp
import numpy as np
from jax.experimental import pallas as pl
from jax.experimental.pallas import tpu as pltpu

CONTEXT_SIZE = 256


def _pick_tile(n, candidates=(512, 256, 128, 64, 32, 16, 8)):
    for t in candidates:
        if n % t == 0:
            return t
    return n


def _vmem_limit(stream_bytes, resident_bytes=0):
    # double-buffered streamed blocks + resident scratch + headroom
    est = 2 * stream_bytes + resident_bytes + (4 << 20)
    return int(min(max(est, 16 << 20), 64 << 20))


# ---------- fused LayerNorm -> multi-head attention -> residual add ----------

def _attn_block_kernel(xq_ref, xf_ref, g_ref, b_ref, wq_ref, wk_ref, wv_ref,
                       wo_ref, bo_ref, o_ref, *, num_heads, head_size, tq):
    qi = pl.program_id(1)
    x_f = xf_ref[0]                               # (T, E)  full rows (K/V side)
    x_q = xq_ref[0]                               # (tq, E) rows of this Q tile
    T = x_f.shape[0]
    E = x_q.shape[-1]

    def layernorm(v):
        m = jnp.mean(v, axis=-1, keepdims=True)
        var = jnp.mean((v - m) * (v - m), axis=-1, keepdims=True)
        return (v - m) * jax.lax.rsqrt(var + 1e-5) * g_ref[...] + b_ref[...]

    xn_f = layernorm(x_f).astype(jnp.bfloat16)
    xn_q = layernorm(x_q).astype(jnp.bfloat16)

    # causal mask with the global row offset of this Q tile.
    row = qi * tq + jax.lax.broadcasted_iota(jnp.int32, (tq, T), 0)
    col = jax.lax.broadcasted_iota(jnp.int32, (tq, T), 1)
    causal = col <= row
    # -1e30 (not -inf) is safe: the diagonal is always unmasked so no row is
    # ever fully masked.
    neg = jnp.float32(-1e30)

    proj = jnp.zeros((tq, E), jnp.float32)
    for h in range(num_heads):        # static unroll; weights indexed on the
                                      # leading head dim (no lane slicing)
        # 1/sqrt(head_size) is folded into wq host-side.
        qh = jnp.dot(xn_q, wq_ref[h], preferred_element_type=jnp.float32)
        kh = jnp.dot(xn_f, wk_ref[h], preferred_element_type=jnp.float32)
        vh = jnp.dot(xn_f, wv_ref[h], preferred_element_type=jnp.float32)

        s = jax.lax.dot_general(                  # q @ k^T, (tq, T) f32
            qh.astype(jnp.bfloat16), kh.astype(jnp.bfloat16),
            (((1,), (1,)), ((), ())),
            preferred_element_type=jnp.float32)
        s = jnp.where(causal, s, neg)
        s = s - jnp.max(s, axis=-1, keepdims=True)
        p = jnp.exp(s)
        p = p * pl.reciprocal(jnp.sum(p, axis=-1, keepdims=True), approx=True)

        oh = jnp.dot(p.astype(jnp.bfloat16), vh.astype(jnp.bfloat16),
                     preferred_element_type=jnp.float32)          # (tq, hs)
        # per-head output projection accumulated in f32: replaces the
        # concatenate + single (E,E) projection (no lane-concat relayout).
        proj = proj + jnp.dot(oh.astype(jnp.bfloat16), wo_ref[h],
                              preferred_element_type=jnp.float32)  # (tq, E)

    o_ref[0] = (proj + bo_ref[...] + x_q).astype(o_ref.dtype)


def attn_block(x, g, b, wq_r, wk_r, wv_r, wo_r, bo, *, num_heads, head_size):
    B, T, E = x.shape
    # cap tq at 128 so long contexts expose >=2 parallel steps for v7x's 2 TCs
    tq = _pick_tile(T, (128, 64, 32, 16, 8))
    kernel = functools.partial(_attn_block_kernel, num_heads=num_heads,
                               head_size=head_size, tq=tq)
    stream = (tq * E + T * E + 2 * E + E + tq * E) * 4 + 4 * E * E * 2
    vlim = _vmem_limit(stream)
    return pl.pallas_call(
        kernel,
        out_shape=jax.ShapeDtypeStruct((B, T, E), x.dtype),
        grid=(B, T // tq),
        in_specs=[
            pl.BlockSpec((1, tq, E), lambda bi, qi: (bi, qi, 0)),   # Q rows
            pl.BlockSpec((1, T, E), lambda bi, qi: (bi, 0, 0)),     # full rows
            pl.BlockSpec((1, E), lambda bi, qi: (0, 0)),
            pl.BlockSpec((1, E), lambda bi, qi: (0, 0)),
            # TODO(synk): pipeline_mode=pl.Buffered(1) on these grid-invariant
            # bf16 weight blocks would halve their VMEM footprint further.
            pl.BlockSpec((num_heads, E, head_size), lambda bi, qi: (0, 0, 0)),
            pl.BlockSpec((num_heads, E, head_size), lambda bi, qi: (0, 0, 0)),
            pl.BlockSpec((num_heads, E, head_size), lambda bi, qi: (0, 0, 0)),
            pl.BlockSpec((num_heads, head_size, E), lambda bi, qi: (0, 0, 0)),
            pl.BlockSpec((1, E), lambda bi, qi: (0, 0)),
        ],
        out_specs=pl.BlockSpec((1, tq, E), lambda bi, qi: (bi, qi, 0)),
        compiler_params=pltpu.CompilerParams(
            dimension_semantics=("parallel", "parallel"),
            vmem_limit_bytes=vlim),
    )(x, x, g.reshape(1, E), b.reshape(1, E),
      wq_r, wk_r, wv_r, wo_r, bo.reshape(1, E))


# ------- fused LayerNorm -> FFN (Linear/ReLU/Linear) -> residual, K-tiled -----

def _ffn_block_kernel(x_ref, g_ref, b_ref, w1_ref, b1_ref, w2_ref, b2_ref,
                      o_ref, xn_sc, acc_sc):
    k = pl.program_id(1)

    @pl.when(k == 0)
    def _():
        x = x_ref[...]
        m = jnp.mean(x, axis=-1, keepdims=True)
        var = jnp.mean((x - m) * (x - m), axis=-1, keepdims=True)
        xn = (x - m) * jax.lax.rsqrt(var + 1e-5) * g_ref[...] + b_ref[...]
        xn_sc[...] = xn.astype(jnp.bfloat16)
        acc_sc[...] = jnp.zeros_like(acc_sc)

    # ReLU is elementwise over H, so per-chunk ReLU + accumulation is exact.
    h = jnp.dot(xn_sc[...], w1_ref[...],
                preferred_element_type=jnp.float32) + b1_ref[...]
    h = jnp.maximum(h, 0.0)
    acc_sc[...] += jnp.dot(h.astype(jnp.bfloat16), w2_ref[...],
                           preferred_element_type=jnp.float32)

    @pl.when(k == pl.num_programs(1) - 1)
    def _():
        o_ref[...] = (acc_sc[...] + b2_ref[...] + x_ref[...]).astype(o_ref.dtype)


def ffn_block(x, g, b, w1_16, b1, w2_16, b2):
    B, T, E = x.shape
    H = w1_16.shape[1]
    N = B * T
    x2 = x.reshape(N, E)
    Np = -(-N // 8) * 8
    if Np != N:
        x2 = jnp.pad(x2, ((0, Np - N), (0, 0)))
    tm = _pick_tile(Np)
    th = _pick_tile(H, (2048, 1024, 512, 256, 128))

    stream = (tm * E + 2 * E + th + E + tm * E) * 4 + (E * th + th * E) * 2
    resident = tm * E * 2 + tm * E * 4                       # xn_sc + acc_sc
    vlim = _vmem_limit(stream, resident)

    out = pl.pallas_call(
        _ffn_block_kernel,
        out_shape=jax.ShapeDtypeStruct((Np, E), x.dtype),
        grid=(Np // tm, H // th),                # rows parallel, H reduction
        in_specs=[
            pl.BlockSpec((tm, E), lambda i, k: (i, 0)),
            pl.BlockSpec((1, E), lambda i, k: (0, 0)),
            pl.BlockSpec((1, E), lambda i, k: (0, 0)),
            pl.BlockSpec((E, th), lambda i, k: (0, k)),
            pl.BlockSpec((1, th), lambda i, k: (0, k)),
            pl.BlockSpec((th, E), lambda i, k: (k, 0)),
            pl.BlockSpec((1, E), lambda i, k: (0, 0)),
        ],
        out_specs=pl.BlockSpec((tm, E), lambda i, k: (i, 0)),
        scratch_shapes=[pltpu.VMEM((tm, E), jnp.bfloat16),
                        pltpu.VMEM((tm, E), jnp.float32)],
        compiler_params=pltpu.CompilerParams(
            dimension_semantics=("parallel", "arbitrary"),
            vmem_limit_bytes=vlim),
    )(x2, g.reshape(1, E), b.reshape(1, E), w1_16, b1.reshape(1, H),
      w2_16, b2.reshape(1, E))
    return out[:N].reshape(B, T, E)


# --------------------------- tiled vocab projection ---------------------------

def _linear_kernel(x_ref, w_ref, b_ref, o_ref):
    o_ref[...] = (jnp.dot(x_ref[...].astype(jnp.bfloat16), w_ref[...],
                          preferred_element_type=jnp.float32)
                  + b_ref[...]).astype(o_ref.dtype)


def linear_proj(x2, w16, b):
    N, E = x2.shape
    V = w16.shape[1]
    # pad rows to a sublane multiple and vocab to a lane multiple so tiles stay
    # lane-dense and the whole (E,V) weight never has to live in VMEM at once.
    Np = -(-N // 8) * 8
    Vp = -(-V // 128) * 128
    if Np != N:
        x2 = jnp.pad(x2, ((0, Np - N), (0, 0)))
    if Vp != V:
        w16 = jnp.pad(w16, ((0, 0), (0, Vp - V)))
        b = jnp.pad(b, ((0, Vp - V),))
    tm = _pick_tile(Np)
    tn = _pick_tile(Vp, (512, 256, 128))

    stream = tm * E * 4 + E * tn * 2 + tn * 4 + tm * tn * 4
    vlim = _vmem_limit(stream)

    out = pl.pallas_call(
        _linear_kernel,
        out_shape=jax.ShapeDtypeStruct((Np, Vp), x2.dtype),
        # vocab axis OUTER, row axis inner: each (E,tn) weight tile streams
        # from HBM exactly once while the small x tiles are re-read.
        grid=(Vp // tn, Np // tm),
        in_specs=[
            pl.BlockSpec((tm, E), lambda j, i: (i, 0)),
            pl.BlockSpec((E, tn), lambda j, i: (0, j)),
            pl.BlockSpec((1, tn), lambda j, i: (0, j)),
        ],
        out_specs=pl.BlockSpec((tm, tn), lambda j, i: (i, j)),
        compiler_params=pltpu.CompilerParams(
            dimension_semantics=("parallel", "parallel"),
            vmem_limit_bytes=vlim),
    )(x2, w16, b.reshape(1, Vp))
    return out[:N, :V]


# ------------------------ parameter init / prep / forward ---------------------

def init_params(key, vocab_size, embed_dim, n_heads, n_blocks):
    keys = iter(jax.random.split(key, 4 + 8 * n_blocks))
    nrm = lambda k, shp, s=0.02: (jax.random.normal(k, shp, jnp.float32) * s)

    params = {
        "tok_emb": nrm(next(keys), (vocab_size, embed_dim)),
        "pos_emb": nrm(next(keys), (CONTEXT_SIZE, embed_dim)),
        "w_out": nrm(next(keys), (embed_dim, vocab_size)),
        "b_out": jnp.zeros((vocab_size,), jnp.float32),
        "blocks": [],
    }
    for _ in range(n_blocks):
        blk = {
            "ln1_g": jnp.ones((embed_dim,), jnp.float32),
            "ln1_b": jnp.zeros((embed_dim,), jnp.float32),
            "ln2_g": jnp.ones((embed_dim,), jnp.float32),
            "ln2_b": jnp.zeros((embed_dim,), jnp.float32),
            "wq": nrm(next(keys), (embed_dim, embed_dim)),
            "wk": nrm(next(keys), (embed_dim, embed_dim)),
            "wv": nrm(next(keys), (embed_dim, embed_dim)),
            "wo": nrm(next(keys), (embed_dim, embed_dim)),
            "bo": jnp.zeros((embed_dim,), jnp.float32),
            "w1": nrm(next(keys), (embed_dim, 4 * embed_dim)),
            "b1": jnp.zeros((4 * embed_dim,), jnp.float32),
            "w2": nrm(next(keys), (4 * embed_dim, embed_dim)),
            "b2": jnp.zeros((embed_dim,), jnp.float32),
        }
        params["blocks"].append(blk)
    return params


def prepare_params(params, n_heads):
    """Host-side one-time prep: bf16 weights, head-major layouts, scale fold."""
    E = params["tok_emb"].shape[1]
    hs = E // n_heads
    scale = hs ** -0.5

    def per_head(w):                  # (E, nh*hs) -> (nh, E, hs)
        return jnp.transpose(w.reshape(E, n_heads, hs), (1, 0, 2))

    p = {
        "tok_emb": params["tok_emb"],
        "pos_emb": params["pos_emb"],
        "w_out": params["w_out"].astype(jnp.bfloat16),
        "b_out": params["b_out"],
        "blocks": [],
    }
    for blk in params["blocks"]:
        p["blocks"].append({
            "ln1_g": blk["ln1_g"], "ln1_b": blk["ln1_b"],
            "ln2_g": blk["ln2_g"], "ln2_b": blk["ln2_b"],
            "wq_r": per_head(blk["wq"] * scale).astype(jnp.bfloat16),
            "wk_r": per_head(blk["wk"]).astype(jnp.bfloat16),
            "wv_r": per_head(blk["wv"]).astype(jnp.bfloat16),
            "wo_r": blk["wo"].reshape(n_heads, hs, E).astype(jnp.bfloat16),
            "bo": blk["bo"],
            "w1": blk["w1"].astype(jnp.bfloat16), "b1": blk["b1"],
            "w2": blk["w2"].astype(jnp.bfloat16), "b2": blk["b2"],
        })
    return p


def transformer_abs_pos_forward(params, tokens, *, n_heads):
    B, T = tokens.shape
    E = params["tok_emb"].shape[1]
    hs = E // n_heads
    p = prepare_params(params, n_heads)

    # TODO(synk): token/positional embedding gather kept in plain JAX
    # (data-dependent gather; would need a DMA-gather Pallas kernel).
    tok = jnp.take(p["tok_emb"], tokens, axis=0)                # (B, T, E)
    x = tok + p["pos_emb"][:T][None, :, :]

    for blk in p["blocks"]:
        x = attn_block(x, blk["ln1_g"], blk["ln1_b"],
                       blk["wq_r"], blk["wk_r"], blk["wv_r"],
                       blk["wo_r"], blk["bo"],
                       num_heads=n_heads, head_size=hs)
        x = ffn_block(x, blk["ln2_g"], blk["ln2_b"],
                      blk["w1"], blk["b1"], blk["w2"], blk["b2"])

    # NOTE: reference forward() skips self.lnorm -- reproduce exactly.
    logits = linear_proj(x.reshape(B * T, E), p["w_out"], p["b_out"])
    return logits.reshape(B, T, -1)


# ------------------------- pure-JAX reference (f32) ---------------------------

def reference_forward(params, tokens, *, n_heads):
    B, T = tokens.shape
    E = params["tok_emb"].shape[1]
    hs = E // n_heads
    tok = jnp.take(params["tok_emb"], tokens, axis=0)
    x = tok + params["pos_emb"][:T][None]

    def ln(v, g, b):
        m = jnp.mean(v, -1, keepdims=True)
        var = jnp.mean((v - m) ** 2, -1, keepdims=True)
        return (v - m) * jax.lax.rsqrt(var + 1e-5) * g + b

    mask = jnp.tril(jnp.ones((T, T), bool))
    for blk in params["blocks"]:
        h = ln(x, blk["ln1_g"], blk["ln1_b"])
        outs = []
        for hd in range(n_heads):
            lo, hi = hd * hs, (hd + 1) * hs
            q = h @ blk["wq"][:, lo:hi]
            k = h @ blk["wk"][:, lo:hi]
            v = h @ blk["wv"][:, lo:hi]
            wei = (q @ jnp.swapaxes(k, 1, 2)) * hs ** -0.5
            wei = jnp.where(mask, wei, -jnp.inf)
            wei = jax.nn.softmax(wei, axis=-1)
            outs.append(wei @ v)
        x = jnp.concatenate(outs, axis=-1) @ blk["wo"] + blk["bo"] + x
        h = ln(x, blk["ln2_g"], blk["ln2_b"])
        ff = jnp.maximum(h @ blk["w1"] + blk["b1"], 0.0) @ blk["w2"] + blk["b2"]
        x = ff + x
    return x @ params["w_out"] + params["b_out"]


if __name__ == "__main__":
    B, T = 2, 8
    vocab_size, embed_dim, n_heads, n_blocks = 512, 32, 2, 2

    key = jax.random.PRNGKey(0)
    k_params, k_tok = jax.random.split(key)
    params = init_params(k_params, vocab_size, embed_dim, n_heads, n_blocks)
    tokens = jax.random.randint(k_tok, (B, T), 0, vocab_size, dtype=jnp.int32)

    logits = transformer_abs_pos_forward(params, tokens, n_heads=n_heads)
    logits = jax.block_until_ready(logits)

    ref = jax.block_until_ready(
        reference_forward(params, tokens, n_heads=n_heads))

    assert logits.shape == (B, T, vocab_size)
    assert np.allclose(np.asarray(logits), np.asarray(ref),
                       rtol=2e-2, atol=2e-2), "mismatch vs reference"
    print("KERNEL_OK")
</pallas_src>

<mosaic_0001>
module attributes {stable_mosaic.version = 11 : i64} {
  func.func @_attn_block_kernel(%arg0: i32, %arg1: i32, %arg2: memref<1x8x32xf32, #tpu.memory_space<vmem>>, %arg3: memref<1x8x32xf32, #tpu.memory_space<vmem>>, %arg4: memref<1x32xf32, #tpu.memory_space<vmem>>, %arg5: memref<1x32xf32, #tpu.memory_space<vmem>>, %arg6: memref<2x32x16xbf16, #tpu.memory_space<vmem>>, %arg7: memref<2x32x16xbf16, #tpu.memory_space<vmem>>, %arg8: memref<2x32x16xbf16, #tpu.memory_space<vmem>>, %arg9: memref<2x16x32xbf16, #tpu.memory_space<vmem>>, %arg10: memref<1x32xf32, #tpu.memory_space<vmem>>, %arg11: memref<1x8x32xf32, #tpu.memory_space<vmem>>) attributes {dimension_semantics = [#tpu.dimension_semantics<parallel>, #tpu.dimension_semantics<parallel>], iteration_bounds = array<i64: 2, 1>, scalar_prefetch = 0 : i64, scratch_operands = 0 : i64, tpu.core_type = #tpu.core_type<tc>, window_params = [{transform_indices = @transform_0, window_bounds = array<i64: 1, 8, 32>}, {transform_indices = @transform_1, window_bounds = array<i64: 1, 8, 32>}, {pipeline_mode = #tpu.pipeline_mode<synchronous>, transform_indices = @transform_2, window_bounds = array<i64: 1, 32>}, {pipeline_mode = #tpu.pipeline_mode<synchronous>, transform_indices = @transform_3, window_bounds = array<i64: 1, 32>}, {pipeline_mode = #tpu.pipeline_mode<synchronous>, transform_indices = @transform_4, window_bounds = array<i64: 2, 32, 16>}, {pipeline_mode = #tpu.pipeline_mode<synchronous>, transform_indices = @transform_5, window_bounds = array<i64: 2, 32, 16>}, {pipeline_mode = #tpu.pipeline_mode<synchronous>, transform_indices = @transform_6, window_bounds = array<i64: 2, 32, 16>}, {pipeline_mode = #tpu.pipeline_mode<synchronous>, transform_indices = @transform_7, window_bounds = array<i64: 2, 16, 32>}, {pipeline_mode = #tpu.pipeline_mode<synchronous>, transform_indices = @transform_8, window_bounds = array<i64: 1, 32>}, {transform_indices = @transform_9, window_bounds = array<i64: 1, 8, 32>}]} {
    %c0 = arith.constant 0 : index
    %c0_0 = arith.constant 0 : index
    %c0_1 = arith.constant 0 : index
    %0 = vector.load %arg3[%c0, %c0_0, %c0_1] : memref<1x8x32xf32, #tpu.memory_space<vmem>>, vector<1x8x32xf32>
    %1 = vector.shape_cast %0 : vector<1x8x32xf32> to vector<8x32xf32>
    %c0_2 = arith.constant 0 : index
    %c0_3 = arith.constant 0 : index
    %c0_4 = arith.constant 0 : index
    %2 = vector.load %arg2[%c0_2, %c0_3, %c0_4] : memref<1x8x32xf32, #tpu.memory_space<vmem>>, vector<1x8x32xf32>
    %3 = vector.shape_cast %2 : vector<1x8x32xf32> to vector<8x32xf32>
    %cst = arith.constant dense<0.000000e+00> : vector<8xf32>
    %4 = vector.multi_reduction <add>, %1, %cst [1] : vector<8x32xf32> to vector<8xf32>
    %5 = vector.shape_cast %4 : vector<8xf32> to vector<8x1xf32>
    %cst_5 = arith.constant 3.200000e+01 : f32
    %6 = vector.broadcast %cst_5 : f32 to vector<8x1xf32>
    %7 = arith.divf %5, %6 : vector<8x1xf32>
    %8 = vector.broadcast %7 : vector<8x1xf32> to vector<8x32xf32>
    %9 = arith.subf %1, %8 : vector<8x32xf32>
    %10 = vector.broadcast %7 : vector<8x1xf32> to vector<8x32xf32>
    %11 = arith.subf %1, %10 : vector<8x32xf32>
    %12 = arith.mulf %9, %11 : vector<8x32xf32>
    %cst_6 = arith.constant dense<0.000000e+00> : vector<8xf32>
    %13 = vector.multi_reduction <add>, %12, %cst_6 [1] : vector<8x32xf32> to vector<8xf32>
    %14 = vector.shape_cast %13 : vector<8xf32> to vector<8x1xf32>
    %cst_7 = arith.constant 3.200000e+01 : f32
    %15 = vector.broadcast %cst_7 : f32 to vector<8x1xf32>
    %16 = arith.divf %14, %15 : vector<8x1xf32>
    %17 = vector.broadcast %7 : vector<8x1xf32> to vector<8x32xf32>
    %18 = arith.subf %1, %17 : vector<8x32xf32>
    %cst_8 = arith.constant 9.99999974E-6 : f32
    %19 = vector.broadcast %cst_8 : f32 to vector<8x1xf32>
    %20 = arith.addf %16, %19 : vector<8x1xf32>
    %21 = math.rsqrt %20 : vector<8x1xf32>
    %22 = vector.broadcast %21 : vector<8x1xf32> to vector<8x32xf32>
    %23 = arith.mulf %18, %22 : vector<8x32xf32>
    %c0_9 = arith.constant 0 : index
    %c0_10 = arith.constant 0 : index
    %24 = vector.load %arg4[%c0_9, %c0_10] : memref<1x32xf32, #tpu.memory_space<vmem>>, vector<1x32xf32>
    %25 = vector.broadcast %24 : vector<1x32xf32> to vector<8x32xf32>
    %26 = arith.mulf %23, %25 : vector<8x32xf32>
    %c0_11 = arith.constant 0 : index
    %c0_12 = arith.constant 0 : index
    %27 = vector.load %arg5[%c0_11, %c0_12] : memref<1x32xf32, #tpu.memory_space<vmem>>, vector<1x32xf32>
    %28 = vector.broadcast %27 : vector<1x32xf32> to vector<8x32xf32>
    %29 = arith.addf %26, %28 : vector<8x32xf32>
    %30 = arith.truncf %29 : vector<8x32xf32> to vector<8x32xbf16>
    %cst_13 = arith.constant dense<0.000000e+00> : vector<8xf32>
    %31 = vector.multi_reduction <add>, %3, %cst_13 [1] : vector<8x32xf32> to vector<8xf32>
    %32 = vector.shape_cast %31 : vector<8xf32> to vector<8x1xf32>
    %cst_14 = arith.constant 3.200000e+01 : f32
    %33 = vector.broadcast %cst_14 : f32 to vector<8x1xf32>
    %34 = arith.divf %32, %33 : vector<8x1xf32>
    %35 = vector.broadcast %34 : vector<8x1xf32> to vector<8x32xf32>
    %36 = arith.subf %3, %35 : vector<8x32xf32>
    %37 = vector.broadcast %34 : vector<8x1xf32> to vector<8x32xf32>
    %38 = arith.subf %3, %37 : vector<8x32xf32>
    %39 = arith.mulf %36, %38 : vector<8x32xf32>
    %cst_15 = arith.constant dense<0.000000e+00> : vector<8xf32>
    %40 = vector.multi_reduction <add>, %39, %cst_15 [1] : vector<8x32xf32> to vector<8xf32>
    %41 = vector.shape_cast %40 : vector<8xf32> to vector<8x1xf32>
    %cst_16 = arith.constant 3.200000e+01 : f32
    %42 = vector.broadcast %cst_16 : f32 to vector<8x1xf32>
    %43 = arith.divf %41, %42 : vector<8x1xf32>
    %44 = vector.broadcast %34 : vector<8x1xf32> to vector<8x32xf32>
    %45 = arith.subf %3, %44 : vector<8x32xf32>
    %cst_17 = arith.constant 9.99999974E-6 : f32
    %46 = vector.broadcast %cst_17 : f32 to vector<8x1xf32>
    %47 = arith.addf %43, %46 : vector<8x1xf32>
    %48 = math.rsqrt %47 : vector<8x1xf32>
    %49 = vector.broadcast %48 : vector<8x1xf32> to vector<8x32xf32>
    %50 = arith.mulf %45, %49 : vector<8x32xf32>
    %c0_18 = arith.constant 0 : index
    %c0_19 = arith.constant 0 : index
    %51 = vector.load %arg4[%c0_18, %c0_19] : memref<1x32xf32, #tpu.memory_space<vmem>>, vector<1x32xf32>
    %52 = vector.broadcast %51 : vector<1x32xf32> to vector<8x32xf32>
    %53 = arith.mulf %50, %52 : vector<8x32xf32>
    %c0_20 = arith.constant 0 : index
    %c0_21 = arith.constant 0 : index
    %54 = vector.load %arg5[%c0_20, %c0_21] : memref<1x32xf32, #tpu.memory_space<vmem>>, vector<1x32xf32>
    %55 = vector.broadcast %54 : vector<1x32xf32> to vector<8x32xf32>
    %56 = arith.addf %53, %55 : vector<8x32xf32>
    %57 = arith.truncf %56 : vector<8x32xf32> to vector<8x32xbf16>
    %c8_i32 = arith.constant 8 : i32
    %58 = arith.muli %arg1, %c8_i32 : i32
    %59 = tpu.iota {dimensions = array<i32: 0>} : vector<8x8xi32>
    %60 = vector.broadcast %58 : i32 to vector<8x8xi32>
    %61 = arith.addi %60, %59 : vector<8x8xi32>
    %62 = tpu.iota {dimensions = array<i32: 1>} : vector<8x8xi32>
    %63 = arith.cmpi sle, %62, %61 : vector<8x8xi32>
    %cst_22 = arith.constant 0.000000e+00 : f32
    %64 = vector.broadcast %cst_22 : f32 to vector<8x32xf32>
    %c0_23 = arith.constant 0 : index
    %c0_24 = arith.constant 0 : index
    %c0_25 = arith.constant 0 : index
    %65 = vector.load %arg6[%c0_23, %c0_24, %c0_25] : memref<2x32x16xbf16, #tpu.memory_space<vmem>>, vector<1x32x16xbf16>
    %66 = vector.shape_cast %65 : vector<1x32x16xbf16> to vector<32x16xbf16>
    %cst_26 = arith.constant dense<0.000000e+00> : vector<8x16xf32>
    %67 = tpu.matmul %57, %66, %cst_26 {dimension_numbers = #tpu.dot_dimension_numbers<[1], [0], [0], [1], [0, 0, 1, 1], [], []>} : vector<8x32xbf16>, vector<32x16xbf16>, vector<8x16xf32> -> vector<8x16xf32>
    %c0_27 = arith.constant 0 : index
    %c0_28 = arith.constant 0 : index
    %c0_29 = arith.constant 0 : index
    %68 = vector.load %arg7[%c0_27, %c0_28, %c0_29] : memref<2x32x16xbf16, #tpu.memory_space<vmem>>, vector<1x32x16xbf16>
    %69 = vector.shape_cast %68 : vector<1x32x16xbf16> to vector<32x16xbf16>
    %cst_30 = arith.constant dense<0.000000e+00> : vector<8x16xf32>
    %70 = tpu.matmul %30, %69, %cst_30 {dimension_numbers = #tpu.dot_dimension_numbers<[1], [0], [0], [1], [0, 0, 1, 1], [], []>} : vector<8x32xbf16>, vector<32x16xbf16>, vector<8x16xf32> -> vector<8x16xf32>
    %c0_31 = arith.constant 0 : index
    %c0_32 = arith.constant 0 : index
    %c0_33 = arith.constant 0 : index
    %71 = vector.load %arg8[%c0_31, %c0_32, %c0_33] : memref<2x32x16xbf16, #tpu.memory_space<vmem>>, vector<1x32x16xbf16>
    %72 = vector.shape_cast %71 : vector<1x32x16xbf16> to vector<32x16xbf16>
    %cst_34 = arith.constant dense<0.000000e+00> : vector<8x16xf32>
    %73 = tpu.matmul %30, %72, %cst_34 {dimension_numbers = #tpu.dot_dimension_numbers<[1], [0], [0], [1], [0, 0, 1, 1], [], []>} : vector<8x32xbf16>, vector<32x16xbf16>, vector<8x16xf32> -> vector<8x16xf32>
    %74 = arith.truncf %67 : vector<8x16xf32> to vector<8x16xbf16>
    %75 = arith.truncf %70 : vector<8x16xf32> to vector<8x16xbf16>
    %cst_35 = arith.constant dense<0.000000e+00> : vector<8x8xf32>
    %76 = tpu.matmul %74, %75, %cst_35 {dimension_numbers = #tpu.dot_dimension_numbers<[1], [1], [0], [0], [0, 0, 1, 0], [], []>} : vector<8x16xbf16>, vector<8x16xbf16>, vector<8x8xf32> -> vector<8x8xf32>
    %cst_36 = arith.constant -1.000000e+30 : f32
    %77 = vector.broadcast %cst_36 : f32 to vector<8x8xf32>
    %78 = arith.select %63, %76, %77 : vector<8x8xi1>, vector<8x8xf32>
    %cst_37 = arith.constant dense<0xFF800000> : vector<8xf32>
    %79 = vector.multi_reduction <maximumf>, %78, %cst_37 [1] : vector<8x8xf32> to vector<8xf32>
    %80 = vector.shape_cast %79 : vector<8xf32> to vector<8x1xf32>
    %81 = vector.broadcast %80 : vector<8x1xf32> to vector<8x8xf32>
    %82 = arith.subf %78, %81 : vector<8x8xf32>
    %83 = math.exp %82 : vector<8x8xf32>
    %cst_38 = arith.constant dense<0.000000e+00> : vector<8xf32>
    %84 = vector.multi_reduction <add>, %83, %cst_38 [1] : vector<8x8xf32> to vector<8xf32>
    %85 = vector.shape_cast %84 : vector<8xf32> to vector<8x1xf32>
    %86 = tpu.reciprocal %85 {approx = true} : vector<8x1xf32> -> vector<8x1xf32>
    %87 = vector.broadcast %86 : vector<8x1xf32> to vector<8x8xf32>
    %88 = arith.mulf %83, %87 : vector<8x8xf32>
    %89 = arith.truncf %88 : vector<8x8xf32> to vector<8x8xbf16>
    %90 = arith.truncf %73 : vector<8x16xf32> to vector<8x16xbf16>
    %cst_39 = arith.constant dense<0.000000e+00> : vector<8x16xf32>
    %91 = tpu.matmul %89, %90, %cst_39 {dimension_numbers = #tpu.dot_dimension_numbers<[1], [0], [0], [1], [0, 0, 1, 1], [], []>} : vector<8x8xbf16>, vector<8x16xbf16>, vector<8x16xf32> -> vector<8x16xf32>
    %92 = arith.truncf %91 : vector<8x16xf32> to vector<8x16xbf16>
    %c0_40 = arith.constant 0 : index
    %c0_41 = arith.constant 0 : index
    %c0_42 = arith.constant 0 : index
    %93 = vector.load %arg9[%c0_40, %c0_41, %c0_42] : memref<2x16x32xbf16, #tpu.memory_space<vmem>>, vector<1x16x32xbf16>
    %94 = vector.shape_cast %93 : vector<1x16x32xbf16> to vector<16x32xbf16>
    %cst_43 = arith.constant dense<0.000000e+00> : vector<8x32xf32>
    %95 = tpu.matmul %92, %94, %cst_43 {dimension_numbers = #tpu.dot_dimension_numbers<[1], [0], [0], [1], [0, 0, 1, 1], [], []>} : vector<8x16xbf16>, vector<16x32xbf16>, vector<8x32xf32> -> vector<8x32xf32>
    %96 = arith.addf %64, %95 : vector<8x32xf32>
    %c1 = arith.constant 1 : index
    %c0_44 = arith.constant 0 : index
    %c0_45 = arith.constant 0 : index
    %97 = vector.load %arg6[%c1, %c0_44, %c0_45] : memref<2x32x16xbf16, #tpu.memory_space<vmem>>, vector<1x32x16xbf16>
    %98 = vector.shape_cast %97 : vector<1x32x16xbf16> to vector<32x16xbf16>
    %cst_46 = arith.constant dense<0.000000e+00> : vector<8x16xf32>
    %99 = tpu.matmul %57, %98, %cst_46 {dimension_numbers = #tpu.dot_dimension_numbers<[1], [0], [0], [1], [0, 0, 1, 1], [], []>} : vector<8x32xbf16>, vector<32x16xbf16>, vector<8x16xf32> -> vector<8x16xf32>
    %c1_47 = arith.constant 1 : index
    %c0_48 = arith.constant 0 : index
    %c0_49 = arith.constant 0 : index
    %100 = vector.load %arg7[%c1_47, %c0_48, %c0_49] : memref<2x32x16xbf16, #tpu.memory_space<vmem>>, vector<1x32x16xbf16>
    %101 = vector.shape_cast %100 : vector<1x32x16xbf16> to vector<32x16xbf16>
    %cst_50 = arith.constant dense<0.000000e+00> : vector<8x16xf32>
    %102 = tpu.matmul %30, %101, %cst_50 {dimension_numbers = #tpu.dot_dimension_numbers<[1], [0], [0], [1], [0, 0, 1, 1], [], []>} : vector<8x32xbf16>, vector<32x16xbf16>, vector<8x16xf32> -> vector<8x16xf32>
    %c1_51 = arith.constant 1 : index
    %c0_52 = arith.constant 0 : index
    %c0_53 = arith.constant 0 : index
    %103 = vector.load %arg8[%c1_51, %c0_52, %c0_53] : memref<2x32x16xbf16, #tpu.memory_space<vmem>>, vector<1x32x16xbf16>
    %104 = vector.shape_cast %103 : vector<1x32x16xbf16> to vector<32x16xbf16>
    %cst_54 = arith.constant dense<0.000000e+00> : vector<8x16xf32>
    %105 = tpu.matmul %30, %104, %cst_54 {dimension_numbers = #tpu.dot_dimension_numbers<[1], [0], [0], [1], [0, 0, 1, 1], [], []>} : vector<8x32xbf16>, vector<32x16xbf16>, vector<8x16xf32> -> vector<8x16xf32>
    %106 = arith.truncf %99 : vector<8x16xf32> to vector<8x16xbf16>
    %107 = arith.truncf %102 : vector<8x16xf32> to vector<8x16xbf16>
    %cst_55 = arith.constant dense<0.000000e+00> : vector<8x8xf32>
    %108 = tpu.matmul %106, %107, %cst_55 {dimension_numbers = #tpu.dot_dimension_numbers<[1], [1], [0], [0], [0, 0, 1, 0], [], []>} : vector<8x16xbf16>, vector<8x16xbf16>, vector<8x8xf32> -> vector<8x8xf32>
    %cst_56 = arith.constant -1.000000e+30 : f32
    %109 = vector.broadcast %cst_56 : f32 to vector<8x8xf32>
    %110 = arith.select %63, %108, %109 : vector<8x8xi1>, vector<8x8xf32>
    %cst_57 = arith.constant dense<0xFF800000> : vector<8xf32>
    %111 = vector.multi_reduction <maximumf>, %110, %cst_57 [1] : vector<8x8xf32> to vector<8xf32>
    %112 = vector.shape_cast %111 : vector<8xf32> to vector<8x1xf32>
    %113 = vector.broadcast %112 : vector<8x1xf32> to vector<8x8xf32>
    %114 = arith.subf %110, %113 : vector<8x8xf32>
    %115 = math.exp %114 : vector<8x8xf32>
    %cst_58 = arith.constant dense<0.000000e+00> : vector<8xf32>
    %116 = vector.multi_reduction <add>, %115, %cst_58 [1] : vector<8x8xf32> to vector<8xf32>
    %117 = vector.shape_cast %116 : vector<8xf32> to vector<8x1xf32>
    %118 = tpu.reciprocal %117 {approx = true} : vector<8x1xf32> -> vector<8x1xf32>
    %119 = vector.broadcast %118 : vector<8x1xf32> to vector<8x8xf32>
    %120 = arith.mulf %115, %119 : vector<8x8xf32>
    %121 = arith.truncf %120 : vector<8x8xf32> to vector<8x8xbf16>
    %122 = arith.truncf %105 : vector<8x16xf32> to vector<8x16xbf16>
    %cst_59 = arith.constant dense<0.000000e+00> : vector<8x16xf32>
    %123 = tpu.matmul %121, %122, %cst_59 {dimension_numbers = #tpu.dot_dimension_numbers<[1], [0], [0], [1], [0, 0, 1, 1], [], []>} : vector<8x8xbf16>, vector<8x16xbf16>, vector<8x16xf32> -> vector<8x16xf32>
    %124 = arith.truncf %123 : vector<8x16xf32> to vector<8x16xbf16>
    %c1_60 = arith.constant 1 : index
    %c0_61 = arith.constant 0 : index
    %c0_62 = arith.constant 0 : index
    %125 = vector.load %arg9[%c1_60, %c0_61, %c0_62] : memref<2x16x32xbf16, #tpu.memory_space<vmem>>, vector<1x16x32xbf16>
    %126 = vector.shape_cast %125 : vector<1x16x32xbf16> to vector<16x32xbf16>
    %cst_63 = arith.constant dense<0.000000e+00> : vector<8x32xf32>
    %127 = tpu.matmul %124, %126, %cst_63 {dimension_numbers = #tpu.dot_dimension_numbers<[1], [0], [0], [1], [0, 0, 1, 1], [], []>} : vector<8x16xbf16>, vector<16x32xbf16>, vector<8x32xf32> -> vector<8x32xf32>
    %128 = arith.addf %96, %127 : vector<8x32xf32>
    %c0_64 = arith.constant 0 : index
    %c0_65 = arith.constant 0 : index
    %129 = vector.load %arg10[%c0_64, %c0_65] : memref<1x32xf32, #tpu.memory_space<vmem>>, vector<1x32xf32>
    %130 = vector.broadcast %129 : vector<1x32xf32> to vector<8x32xf32>
    %131 = arith.addf %128, %130 : vector<8x32xf32>
    %132 = arith.addf %131, %3 : vector<8x32xf32>
    %c0_66 = arith.constant 0 : index
    %c0_67 = arith.constant 0 : index
    %c0_68 = arith.constant 0 : index
    %133 = vector.load %arg11[%c0_66, %c0_67, %c0_68] : memref<1x8x32xf32, #tpu.memory_space<vmem>>, vector<1x8x32xf32>
    %134 = vector.shape_cast %133 : vector<1x8x32xf32> to vector<8x32xf32>
    %135 = vector.shape_cast %132 : vector<8x32xf32> to vector<1x8x32xf32>
    tpu.vector_store %arg11[%c0_66, %c0_67, %c0_68], %135 {strides = array<i32>} : memref<1x8x32xf32, #tpu.memory_space<vmem>>, vector<1x8x32xf32>,
    return
  }
  func.func @transform_0(%arg0: i32, %arg1: i32) -> (i32, i32, i32) {
    %c0_i32 = arith.constant 0 : i32
    %c0_i32_0 = arith.constant 0 : i32
    return %arg0, %arg1, %c0_i32 : i32, i32, i32
  }
  func.func @transform_1(%arg0: i32, %arg1: i32) -> (i32, i32, i32) {
    %c0_i32 = arith.constant 0 : i32
    %c0_i32_0 = arith.constant 0 : i32
    %c0_i32_1 = arith.constant 0 : i32
    return %arg0, %c0_i32, %c0_i32_0 : i32, i32, i32
  }
  func.func @transform_2(%arg0: i32, %arg1: i32) -> (i32, i32) {
    %c0_i32 = arith.constant 0 : i32
    %c0_i32_0 = arith.constant 0 : i32
    %c0_i32_1 = arith.constant 0 : i32
    return %c0_i32, %c0_i32_0 : i32, i32
  }
  func.func @transform_3(%arg0: i32, %arg1: i32) -> (i32, i32) {
    %c0_i32 = arith.constant 0 : i32
    %c0_i32_0 = arith.constant 0 : i32
    %c0_i32_1 = arith.constant 0 : i32
    return %c0_i32, %c0_i32_0 : i32, i32
  }
  func.func @transform_4(%arg0: i32, %arg1: i32) -> (i32, i32, i32) {
    %c0_i32 = arith.constant 0 : i32
    %c0_i32_0 = arith.constant 0 : i32
    %c0_i32_1 = arith.constant 0 : i32
    %c0_i32_2 = arith.constant 0 : i32
    return %c0_i32, %c0_i32_0, %c0_i32_1 : i32, i32, i32
  }
  func.func @transform_5(%arg0: i32, %arg1: i32) -> (i32, i32, i32) {
    %c0_i32 = arith.constant 0 : i32
    %c0_i32_0 = arith.constant 0 : i32
    %c0_i32_1 = arith.constant 0 : i32
    %c0_i32_2 = arith.constant 0 : i32
    return %c0_i32, %c0_i32_0, %c0_i32_1 : i32, i32, i32
  }
  func.func @transform_6(%arg0: i32, %arg1: i32) -> (i32, i32, i32) {
    %c0_i32 = arith.constant 0 : i32
    %c0_i32_0 = arith.constant 0 : i32
    %c0_i32_1 = arith.constant 0 : i32
    %c0_i32_2 = arith.constant 0 : i32
    return %c0_i32, %c0_i32_0, %c0_i32_1 : i32, i32, i32
  }
  func.func @transform_7(%arg0: i32, %arg1: i32) -> (i32, i32, i32) {
    %c0_i32 = arith.constant 0 : i32
    %c0_i32_0 = arith.constant 0 : i32
    %c0_i32_1 = arith.constant 0 : i32
    %c0_i32_2 = arith.constant 0 : i32
    return %c0_i32, %c0_i32_0, %c0_i32_1 : i32, i32, i32
  }
  func.func @transform_8(%arg0: i32, %arg1: i32) -> (i32, i32) {
    %c0_i32 = arith.constant 0 : i32
    %c0_i32_0 = arith.constant 0 : i32
    %c0_i32_1 = arith.constant 0 : i32
    return %c0_i32, %c0_i32_0 : i32, i32
  }
  func.func @transform_9(%arg0: i32, %arg1: i32) -> (i32, i32, i32) {
    %c0_i32 = arith.constant 0 : i32
    %c0_i32_0 = arith.constant 0 : i32
    return %arg0, %arg1, %c0_i32 : i32, i32, i32
  }
}

</mosaic_0001>

<bundles_post_ra>
// kernel: tpu_custom_call.1
= control target key start
LH: loop header
LB: loop body
LE: loop exit
PB: predicated region body
PF: predicated region fallthrough
CT: control target
= control target key end

     0   :  { %14 = vsyncpa [#allocation3], 0  ;;  %s1837_s0 = inlined_call_operand.vmem [shape: f32[2,8,32], index: 0, kind: input, shape index: {}]   ;;  %s1838_s1 = inlined_call_operand.vmem [shape: f32[2,8,32], index: 1, kind: input, shape index: {}]   ;;  %s1839_s2 = inlined_call_operand.vmem [shape: f32[1,32], index: 2, kind: input, shape index: {}]   ;;  %s1840_s3 = inlined_call_operand.vmem [shape: f32[1,32], index: 3, kind: input, shape index: {}]   ;;  %s1841_s4 = inlined_call_operand.vmem [shape: bf16[2,32,16], index: 4, kind: input, shape index: {}]   ;;  %s1842_s5 = inlined_call_operand.vmem [shape: bf16[2,32,16], index: 5, kind: input, shape index: {}]   ;;  %s1843_s6 = inlined_call_operand.vmem [shape: bf16[2,32,16], index: 6, kind: input, shape index: {}]   ;;  %s1844_s7 = inlined_call_operand.vmem [shape: bf16[2,16,32], index: 7, kind: input, shape index: {}]   ;;  %s1845_s8 = inlined_call_operand.vmem [shape: f32[1,32], index: 8, kind: input, shape index: {}]   ;;  %s1846_s9 = inlined_call_operand.hbm [shape: f32[2,8,32], index: 9, kind: output, shape index: {}]  }
   0x1   :  { %16 = vsyncpa [#allocation3 + $0x1], 0  ;;  %s1591_s30 = smov 0   ;;  %s1593_s10 = smov 0  }
   0x2   :  { %s1595_s11 = smov 0   ;;  %s1597_s12 = smov 0  }
   0x3   :  { %s1599_s13 = smov 0   ;;  %s1601_s14 = smov 0  }
   0x4 LB: > { %s1206_s15 = sadd.s32 4294967295, %s1536_s14   ;;  %s1207_s16 = sadd.s32 4294967294, %s1536_s14   ;;  %s1536_s14 = sphi %s1601_s14, %s22_s14   ;;  %s1532_s13 = sphi %s1599_s13, %s1853_s13   ;;  %s1528_s12 = sphi %s1597_s12, %s1852_s12   ;;  %s1524_s11 = sphi %s1595_s11, %s1851_s11   ;;  %s1520_s10 = sphi %s1593_s10, %s1850_s10   ;;  %s1516_s30 = sphi %s1591_s30, %s1849_s30  }
   0x5   : > { %s34_s17 = sadd.s32 1, %s1532_s13  ;;  %s244_s18 = sadd.s32 1, %s1524_s11 }
   0x6   : > { %p36_p0 = scmp.ge.s32.totalorder %s34_s17, 2  ;;  %p254_p1 = scmp.ne.s32.totalorder %s1524_s11, %s1520_s10 }
   0x7   : > { %p255_p2 = scmp.eq.s32.totalorder %s1206_s15, 1  ;;  %p260_p3 = scmp.ne.s32.totalorder %s1520_s10, %s1516_s30 }
   0x8   : > { %s1855_s17 = smov (%p36_p0, %s34_s17), 0  ;;  %p261_p5 = scmp.eq.s32.totalorder %s1207_s16, 1 }
   0x9   : > { %p1631_p4 = por %p255_p2, %p254_p1  ;;  %s239_s20 = ssub.s32 %s1532_s13, %s1855_s17 }
   0xa   : > { %p1210_p6 = scmp.ge.s32.totalorder %s1536_s14, 1  ;;  %p242_p7 = scmp.eq.s32.totalorder %s239_s20, 0 }
   0xb   : > { %p1638_p8 = por %p261_p5, %p260_p3  ;;  %p317_p9 = scmp.lt.s32.totalorder %s1536_s14, 3 }
   0xc   : > { %s1644_s22 = scalar_select %p242_p7, %s1524_s11, %s244_s18  }
   0xd   : > { %p318_p10 = pnand %p1210_p6, %p317_p9 }
   0xe   : > { %p359_p11 = scmp.lt.s32.totalorder (!%p318_p10), %s1528_s12, 1  ;;  %vm373_vm0 = vcmask (!%p318_p10), 261120   ;;  %v1432_v14 = vld [vmem:[%s1842_s5] sm:$0xff] (!%p318_p10)   ;;  %v1538_v16 = vmov (!%p318_p10), 0.0   ;;  %v1434_v17 = vld [vmem:[%s1842_s5 + $0x8] sm:$0xff] (!%p318_p10)   ;;  %vm1539_vm1 = vmmov (!%p318_p10), 0   ;;  %v422_v60 = vlaneseq (!%p318_p10) }
   0xf   : > { %321 = sbr.rel (%p318_p10) target bundleno = 2298 (0x8fa), region = 56  ;;  %v1433_v15 = vld [vmem:[%s1841_s4] sm:$0xff] (!%p318_p10)   ;;  %1299 = vmatprep.subr.bf16.mxu1 (!%p318_p10), %v1538_v16  ;;  %1291 = vmatprep.subr.bf16.mxu0 (!%p318_p10), %v1538_v16  ;;  %v1435_v18 = vld [vmem:[%s1841_s4 + $0x8] sm:$0xff] (!%p318_p10)   ;;  %vm605_vm2 = vcmask (!%p318_p10), 130048   ;;  %v1438_v49 = vld [vmem:[%s1841_s4 + $0x10] sm:$0xff] (!%p318_p10)   ;;  %vm670_vm3 = vcmask (!%p318_p10), 1043456  }
  0x10   : > { %1300 = vmatpush3.bf16.msra.mxu1 (!%p318_p10), %v1432_v14  ;;  %1292 = vmatpush3.bf16.msra.mxu0 (!%p318_p10), %v1433_v15  ;;  %v1214_v26 = vld [vmem:[%s1839_s2] ss:$0 sm:$0xff] (!%p318_p10)  ;;  %v1437_v38 = vld [vmem:[%s1843_s6 + $0x8] sm:$0xff] (!%p318_p10)   ;;  %v1439_v52 = vld [vmem:[%s1841_s4 + $0x18] sm:$0xff] (!%p318_p10)   ;;  %v423_v61 = vshrl.u32 (!%p318_p10), %v422_v60, 7  ;;  %v427_v62 = vand.u32 (!%p318_p10), 127, %v422_v60 }
  0x11   : > { %1301 = vmatprep.subr.bf16.mxu1 (!%p318_p10), %v1538_v16  ;;  %1303 = vmatprep.mubr.msk.bf16.mxu1 (!%p318_p10), %vm1539_vm1, %v1538_v16  ;;  %v1215_v28 = vld [vmem:[%s1840_s3] ss:$0 sm:$0xff] (!%p318_p10)  ;;  %v1440_v58 = vld [vmem:[%s1843_s6 + $0x10] sm:$0xff] (!%p318_p10)   ;;  %v1441_v59 = vld [vmem:[%s1843_s6 + $0x18] sm:$0xff] (!%p318_p10)   ;;  %vm653_vm5 = vcmask (!%p318_p10), 64512  }
  0x12   : > { %1293 = vmatprep.subr.bf16.mxu0 (!%p318_p10), %v1538_v16  ;;  %1295 = vmatprep.mubr.msk.bf16.mxu0 (!%p318_p10), %vm1539_vm1, %v1538_v16  ;;  %v1436_v36 = vld [vmem:[%s1843_s6] sm:$0xff] (!%p318_p10)   ;;  %vm428_vm4 = vcmp.le.s32.totalorder (!%p318_p10), %v427_v62, %v423_v61 }
  0x14   : > { %1302 = vmatpush3.bf16.msra.mxu1 (!%p318_p10), %v1434_v17  ;;  %1294 = vmatpush3.bf16.msra.mxu0 (!%p318_p10), %v1435_v18 }
  0x15   : > { %1315 = vmatprep.subr.bf16.mxu1 (!%p318_p10), %v1538_v16  ;;  %1307 = vmatprep.subr.bf16.mxu0 (!%p318_p10), %v1538_v16 }
  0x16   : > { %s360_s23 = scalar_select %p359_p11, %s1528_s12, 1 }
  0x18   : > { %s1212_s24 = sshll.u32 %s360_s23, 3  ;;  %s1258_s23 = sshll.u32 %s1528_s12, 7 }
  0x19   : > { %s369_s27 = scalar_lea.vmem %s1838_s1, %s1212_s24  ;;  %s365_s15 = scalar_lea.vmem %s1837_s0, %s1212_s24 }
  0x1a   : > { %v371_v0 = vld [vmem:[%s369_s27] sm:$0xff]  ;;  %s1789_s28 = scalar_lea.hbm %s1846_s9, %s1258_s23 }
  0x1b   : > { %v1654_v1 = vld [vmem:[%s365_s15] sm:$0xff]  ;;  %v374_v2 = vsel %vm373_vm0, %v371_v0, 0.0  ;;  %s356_s15 = sand.u32 1, %s1520_s10  }
  0x1c   : > { %v405_v3 = vsel %vm373_vm0, %v1654_v1, 0.0  ;;  %375 = vadd.xlane.f32.xlu0 %v374_v2  ;;  %s1211_s16 = sshll.u32 %s356_s15, 3  ;;  %s1109_s29 = scalar_lea.sflag [#allocation3], %s356_s15 }
  0x1d   : > { %s358_s24 = scalar_lea.vmem [#allocation2], %s1211_s16  ;;  %s1540_s16 = smov [#allocation2]  }
  0x1e   : > { %s1123_s25 = sshll.u32 %s358_s24, 4  ;;  %s1462_s18 = sshll.u32 %s1540_s16, 4  ;;  %s1791_s25 = int_to_ptr.vmem [resolvable:$true] %s1123_s25  ;;  %s1463_s18 = int_to_ptr.vmem [resolvable:$false] %s1462_s18 }
  0x1f   : > { %s1458_s12 = scalar_lea.vmem %s1791_s25, 128  ;;  %s1464_s20 = scalar_lea.vmem %s1463_s18, 256 }
  0x20   : > { %406 = vadd.xlane.f32.xlu0 %v405_v3  ;;  %p1459_p12 = scmp.ne.s32.totalorder %s1791_s25, %s1458_s12  ;;  %p1465_p1 = scmp.lt.s32.totalorder %s1791_s25, %s1463_s18 }
  0x21   : > { %p1466_p2 = scmp.lt.s32.totalorder %s1464_s20, %s1458_s12 }
  0x22   : > { %p1460_p13 = pnand %p1459_p12, %p1631_p4 }
  0x23   : > { %p1467_p3 = por %p1466_p2, %p1465_p1 }
  0x24   : > { %p1461_p0 = pneg %p1460_p13 }
  0x26   : > { %p1468_p5 = pnand %p1467_p3, %p1461_p0 }
  0xa9   : > { %v376_v4 = vpop.xlane.xlu0 %375 }
  0xaa   : > { %v378_v5 = vmul.f32 0.03125, %v376_v4 }
  0xac   : > { %v379_v6 = vsub.f32 %v371_v0, %v378_v5 }
  0xad   : > { %v407_v7 = vpop.xlane.xlu0 %406 }
  0xae   : > { %v408_v8 = vmul.f32 0.03125, %v407_v7  ;;  %v380_v9 = vmul.f32 %v379_v6, %v379_v6 }
  0xb0   : > { %v409_v10 = vsub.f32 %v1654_v1, %v408_v8  ;;  %v381_v11 = vsel %vm373_vm0, %v380_v9, 0.0 }
  0xb1   : > { %382 = vadd.xlane.f32.xlu1 %v381_v11 }
  0xb2   : > { %v410_v12 = vmul.f32 %v409_v10, %v409_v10 }
  0xb4   : > { %v411_v13 = vsel %vm373_vm0, %v410_v12, 0.0 }
  0xb5   : > { %412 = vadd.xlane.f32.xlu1 %v411_v13 }
 0x13e   : > { %v383_v19 = vpop.xlane.xlu1 %382 }
 0x13f   : > { %v384_v20 = vmul.f32 0.03125, %v383_v19 }
 0x141   : > { %v385_v21 = vadd.f32 1e-05, %v384_v20 }
 0x142   : > { %v413_v22 = vpop.xlane.xlu1 %412 }
 0x143   : > { %1446 = vrsqrt.f32 %v385_v21  ;;  %v414_v23 = vmul.f32 0.03125, %v413_v22 }
 0x145   : > { %v415_v24 = vadd.f32 1e-05, %v414_v23 }
 0x147   : > { %1448 = vrsqrt.f32 %v415_v24 }
 0x14d   : > { %v1447_v25 = vpop.eup %1446 }
 0x14e   : > { %v387_v27 = vmul.f32 %v1447_v25, %v379_v6  ;;  %v1442_v25 = vld [vmem:[%s1842_s5 + $0x10] sm:$0xff]  }
 0x150   : > { %v395_v29 = vmul.f32 %v1214_v26, %v387_v27  ;;  %v1443_v27 = vld [vmem:[%s1842_s5 + $0x18] sm:$0xff]  }
 0x151   : > { %v1449_v30 = vpop.eup %1448 }
 0x152   : > { %v403_v31 = vadd.f32 %v1215_v28, %v395_v29  ;;  %v417_v32 = vmul.f32 %v1449_v30, %v409_v10 }
 0x154   : > { %v1690_v33 = vpack.c.bf16 %v403_v31, %v403_v31  ;;  %v418_v34 = vmul.f32 %v1214_v26, %v417_v32 }
 0x156   : > { %1304 = vmatmul.mubr.msk.bf16.vlgmr.msra.gmra.mrb[0].mxu1 %vm373_vm0, %v1690_v33  ;;  %v419_v35 = vadd.f32 %v1215_v28, %v418_v34 }
 0x157   : > { %1317 = vmatprep.mubr.msk.bf16.mxu1 %vm1539_vm1, %v1538_v16 }
 0x158   : > { %v420_v37 = vpack.c.bf16 %v419_v35, %v419_v35 }
 0x15a   : > { %1296 = vmatmul.mubr.msk.bf16.vlgmr.msra.gmra.mrb[0].mxu0 %vm373_vm0, %v420_v37 }
 0x15b   : > { %1308 = vmatpush3.bf16.msra.mxu0 %v1436_v36  ;;  %1311 = vmatprep.mubr.msk.bf16.mxu0 %vm1539_vm1, %v1538_v16 }
 0x15c   : > { %1309 = vmatprep.subr.bf16.mxu0 %v1538_v16 }
 0x15f   : > { %1310 = vmatpush3.bf16.msra.mxu0 %v1437_v38 }
 0x160   : > { %1321 = vmatprep.subr.bf16.mxu0 %v1538_v16 }
 0x162   : > { %1312 = vmatmul.mubr.msk.bf16.vlgmr.msra.gmra.mrb[4].mxu0 %vm373_vm0, %v1690_v33 }
 0x163   : > { %1323 = vmatprep.mubr.msk.bf16.mxu0 %vm1539_vm1, %v1538_v16 }
 0x229   : > { %v541_v39 = vpop.f32.mrb[0].mxu1 }
 0x22a   : > { %v604_v40 = vpack.c.bf16 %v541_v39, %v541_v39  ;;  %v1305_v41 = vpop.f32.mrb[1].mxu1 }
 0x22b   : > { %v544_v42 = vpop.f32.mrb[2].mxu1 }
 0x22c   : > { %v610_v43 = vsel %vm605_vm2, %v604_v40, 0  ;;  %v1306_v44 = vpop.f32.mrb[3].mxu1 }
 0x22d   : > { %v482_v45 = vpop.f32.mrb[0].mxu0  ;;  %1316 = vmatpush3.bf16.xpose.msra.mxu1 %v610_v43 }
 0x22e   : > { %v1297_v46 = vpop.f32.mrb[1].mxu0  ;;  %1327 = vmatprep.subr.bf16.mxu1 %v1538_v16  ;;  %v603_v50 = vpack.c.bf16 %v482_v45, %v482_v45 }
 0x22f   : > { %v485_v47 = vpop.f32.mrb[2].mxu0 }
 0x230   : > { %v1298_v48 = vpop.f32.mrb[3].mxu0 }
 0x234   : > { %1318 = vmatmul.mubr.msk.bf16.vlgmr.msra.gmra.mrb[4].mxu1 %vm605_vm2, %v603_v50  ;;  %v1445_v50 = vld [vmem:[%s1844_s7 + $0x8] sm:$0xff]  }
 0x235   : > { %v597_v51 = vpop.f32.mrb[4].mxu0  ;;  %1328 = vmatpush3.bf16.msra.mxu1 %v1438_v49  ;;  %1331 = vmatprep.mubr.msk.bf16.mxu1 %vm1539_vm1, %v1538_v16 }
 0x236   : > { %v666_v53 = vpack.c.bf16 %v597_v51, %v597_v51  ;;  %v1313_v54 = vpop.f32.mrb[5].mxu0  ;;  %1329 = vmatprep.subr.bf16.mxu1 %v1538_v16 }
 0x237   : > { %v600_v55 = vpop.f32.mrb[6].mxu0  ;;  %v1444_v54 = vld [vmem:[%s1844_s7] sm:$0xff]  }
 0x238   : > { %v672_v56 = vsel %vm670_vm3, %v666_v53, 0  ;;  %v1314_v57 = vpop.f32.mrb[7].mxu0 }
 0x239   : > { %1322 = vmatpush3.bf16.msra.mxu0 %v672_v56  ;;  %1330 = vmatpush3.bf16.msra.mxu1 %v1439_v52 }
 0x23a   : > { %1343 = vmatprep.subr.bf16.mxu1 %v1538_v16  ;;  %1335 = vmatprep.subr.bf16.mxu0 %v1538_v16 }
 0x23c   : > { %1332 = vmatmul.mubr.msk.bf16.vlgmr.msra.gmra.mrb[8].mxu1 %vm373_vm0, %v420_v37 }
 0x23d   : > { %1344 = vmatpush3.bf16.msra.mxu1 %v1440_v58  ;;  %1347 = vmatprep.mubr.msk.bf16.mxu1 %vm1539_vm1, %v1538_v16 }
 0x23e   : > { %1345 = vmatprep.subr.bf16.mxu1 %v1538_v16 }
 0x241   : > { %1346 = vmatpush3.bf16.msra.mxu1 %v1441_v59 }
 0x242   : > { %1357 = vmatprep.subr.bf16.mxu1 %v1538_v16 }
 0x244   : > { %1348 = vmatmul.mubr.msk.bf16.vlgmr.msra.gmra.mrb[12].mxu1 %vm373_vm0, %v1690_v33 }
 0x245   : > { %1359 = vmatprep.mubr.msk.bf16.mxu1 %vm1539_vm1, %v1538_v16 }
 0x307   : > { %v646_v63 = vpop.f32.mrb[4].mxu1 }
 0x308   : > { %v652_v0 = vsel %vm428_vm4, %v646_v63, -1e+30  ;;  %v1319_v2 = vpop.f32.mrb[5].mxu1 }
 0x309   : > { %v649_v3 = vpop.f32.mrb[6].mxu1  ;;  %v654_v4 = vsel %vm653_vm5, %v652_v0, -inf }
 0x30a   : > { %655 = vmax.xlane.f32.xlu0 %v654_v4  ;;  %v1320_v5 = vpop.f32.mrb[7].mxu1 }
 0x30f   : > { %v768_v6 = vpop.f32.mrb[8].mxu1 }
 0x310   : > { %v1333_v7 = vpop.f32.mrb[9].mxu1  ;;  %v888_v39 = vpack.c.bf16 %v768_v6, %v768_v6 }
 0x311   : > { %v771_v8 = vpop.f32.mrb[10].mxu1 }
 0x312   : > { %v1334_v9 = vpop.f32.mrb[11].mxu1 }
 0x317   : > { %v882_v10 = vpop.f32.mrb[12].mxu1 }
 0x318   : > { %v949_v11 = vpack.c.bf16 %v882_v10, %v882_v10  ;;  %v1349_v12 = vpop.f32.mrb[13].mxu1 }
 0x319   : > { %v885_v13 = vpop.f32.mrb[14].mxu1 }
 0x31a   : > { %v954_v14 = vsel %vm670_vm3, %v949_v11, 0  ;;  %v1350_v15 = vpop.f32.mrb[15].mxu1 }
 0x31b   : > { %1358 = vmatpush3.bf16.msra.mxu1 %v954_v14 }
 0x31c   : > { %1369 = vmatprep.subr.bf16.mxu1 %v1538_v16 }
 0x397   : > { %v656_v17 = vpop.xlane.xlu0 %655 }
 0x398   : > { %v657_v18 = vsub.f32 %v652_v0, %v656_v17 }
 0x39a   : > { %v658_v19 = vmul.f32 1.442695, %v657_v18 }
 0x39c   : > { %1450 = vpow2.f32 %v658_v19 }
 0x3a6   : > { %v1451_v20 = vpop.eup %1450 }
 0x3a7   : > { %v660_v21 = vsel %vm653_vm5, %v1451_v20, 0.0 }
 0x3a8   : > { %661 = vadd.xlane.f32.xlu1 %v660_v21 }
 0x435   : > { %v662_v22 = vpop.xlane.xlu1 %661 }
 0x436   : > { %1452 = vrcp.f32 %v662_v22 }
 0x440   : > { %v1453_v23 = vpop.eup %1452 }
 0x441   : > { %v664_v24 = vmul.f32 %v1453_v23, %v1451_v20 }
 0x443   : > { %v665_v26 = vpack.c.bf16 %v664_v24, %v664_v24 }
 0x445   : > { %1324 = vmatmul.mubr.msk.bf16.vlgmr.msra.gmra.mrb[8].mxu0 %vm653_vm5, %v665_v26 }
 0x446   : > { %1336 = vmatpush3.bf16.msra.mxu0 %v1442_v25  ;;  %1339 = vmatprep.mubr.msk.bf16.mxu0 %vm1539_vm1, %v1538_v16 }
 0x447   : > { %1337 = vmatprep.subr.bf16.mxu0 %v1538_v16 }
 0x44a   : > { %1338 = vmatpush3.bf16.msra.mxu0 %v1443_v27 }
 0x44b   : > { %1351 = vmatprep.subr.bf16.mxu0 %v1538_v16 }
 0x44d   : > { %1340 = vmatmul.mubr.msk.bf16.vlgmr.msra.gmra.mrb[12].mxu0 %vm373_vm0, %v1690_v33 }
 0x44e   : > { %1353 = vmatprep.mubr.msk.bf16.mxu0 %vm1539_vm1, %v1538_v16 }
 0x518   : > { %v708_v28 = vpop.f32.mrb[8].mxu0 }
 0x519   : > { %v1325_v29 = vpop.f32.mrb[9].mxu0  ;;  %v714_v56 = vpack.c.bf16 %v708_v28, %v708_v28 }
 0x51a   : > { %v711_v30 = vpop.f32.mrb[10].mxu0 }
 0x51b   : > { %v1326_v31 = vpop.f32.mrb[11].mxu0 }
 0x520   : > { %v825_v32 = vpop.f32.mrb[12].mxu0 }
 0x521   : > { %v889_v34 = vpack.c.bf16 %v825_v32, %v825_v32  ;;  %v1341_v35 = vpop.f32.mrb[13].mxu0 }
 0x522   : > { %v828_v36 = vpop.f32.mrb[14].mxu0 }
 0x523   : > { %v894_v37 = vsel %vm605_vm2, %v889_v34, 0  ;;  %v1342_v38 = vpop.f32.mrb[15].mxu0 }
 0x524   : > { %1352 = vmatpush3.bf16.xpose.msra.mxu0 %v894_v37 }
 0x525   : > { %1363 = vmatprep.subr.bf16.mxu0 %v1538_v16 }
 0x52b   : > { %1354 = vmatmul.mubr.msk.bf16.vlgmr.msra.gmra.mrb[16].mxu0 %vm605_vm2, %v888_v39 }
 0x52c   : > { %1365 = vmatprep.mubr.msk.bf16.mxu0 %vm1539_vm1, %v1538_v16  ;;  %1364 = vmatpush3.bf16.msra.mxu0 %v1445_v50 }
 0x5fe   : > { %v930_v33 = vpop.f32.mrb[16].mxu0 }
 0x5ff   : > { %v936_v40 = vsel %vm428_vm4, %v930_v33, -1e+30  ;;  %v1355_v41 = vpop.f32.mrb[17].mxu0 }
 0x600   : > { %v933_v42 = vpop.f32.mrb[18].mxu0  ;;  %v937_v43 = vsel %vm653_vm5, %v936_v40, -inf }
 0x601   : > { %938 = vmax.xlane.f32.xlu0 %v937_v43  ;;  %v1356_v44 = vpop.f32.mrb[19].mxu0 }
 0x68e   : > { %v939_v45 = vpop.xlane.xlu0 %938 }
 0x68f   : > { %v940_v46 = vsub.f32 %v936_v40, %v939_v45 }
 0x691   : > { %v941_v47 = vmul.f32 1.442695, %v940_v46 }
 0x693   : > { %1454 = vpow2.f32 %v941_v47 }
 0x69d   : > { %v1455_v48 = vpop.eup %1454 }
 0x69e   : > { %v943_v49 = vsel %vm653_vm5, %v1455_v48, 0.0 }
 0x69f   : > { %944 = vadd.xlane.f32.xlu1 %v943_v49 }
 0x72c   : > { %v945_v51 = vpop.xlane.xlu1 %944 }
 0x72d   : > { %1456 = vrcp.f32 %v945_v51 }
 0x737   : > { %v1457_v52 = vpop.eup %1456 }
 0x738   : > { %v947_v53 = vmul.f32 %v1457_v52, %v1455_v48 }
 0x73a   : > { %v948_v55 = vpack.c.bf16 %v947_v53, %v947_v53 }
 0x73c   : > { %1360 = vmatmul.mubr.msk.bf16.vlgmr.msra.gmra.mrb[16].mxu1 %vm653_vm5, %v948_v55 }
 0x73d   : > { %1370 = vmatpush3.bf16.msra.mxu1 %v1444_v54  ;;  %1371 = vmatprep.mubr.msk.bf16.mxu1 %vm1539_vm1, %v1538_v16  ;;  %v1256_v16 = vld [vmem:[%s1845_s8] ss:$0 sm:$0xff] }
 0x744   : > { %1372 = vmatmul.mubr.msk.bf16.vlgmr.msra.gmra.mrb[20].mxu1 %vm605_vm2, %v714_v56 }
 0x80f   : > { %v990_v57 = vpop.f32.mrb[16].mxu1 }
 0x810   : > { %v996_v58 = vpack.c.bf16 %v990_v57, %v990_v57  ;;  %v1361_v59 = vpop.f32.mrb[17].mxu1 }
 0x811   : > { %v993_v60 = vpop.f32.mrb[18].mxu1 }
 0x812   : > { %v1362_v61 = vpop.f32.mrb[19].mxu1  ;;  %1366 = vmatmul.mubr.msk.bf16.vlgmr.msra.gmra.mrb[20].mxu0 %vm605_vm2, %v996_v58 }
 0x817   : > { %v1092_v62 = vpop.f32.mrb[20].mxu1 }
 0x818   : > { %v1373_v63 = vpop.f32.mrb[21].mxu1 }
 0x819   : > { %v1095_v0 = vpop.f32.mrb[22].mxu1 }
 0x81a   : > { %v1374_v2 = vpop.f32.mrb[23].mxu1 }
 0x8e5   : > { %v1043_v3 = vpop.f32.mrb[20].mxu0 }
 0x8e6   : > { %v1093_v4 = vadd.f32 %v1092_v62, %v1043_v3  ;;  %v1367_v5 = vpop.f32.mrb[21].mxu0 }
 0x8e7   : > { %v1046_v6 = vpop.f32.mrb[22].mxu0 }
 0x8e8   : > { %v1105_v7 = vadd.f32 %v1256_v16, %v1093_v4  ;;  %v1368_v8 = vpop.f32.mrb[23].mxu0 }
 0x8ea   : > { %v1106_v9 = vadd.f32 %v1105_v7, %v1654_v1 }
 0x8ec   : > { %1107 = vst.msk [vmem:[%s358_s24] sm:$0xff] %vm373_vm0, %v1106_v9 }
 0x8ed   : > { %1471 = shalt.err (!%p1468_p5)
}
 0x8ee   : > { %s1472_s15 = scalar_lea.hbm %s1789_s28, 128  ;;  %s1476_s26 = scalar_lea.hbm %s1846_s9, 256 }
 0x8ef   : > { %p1473_p6 = scmp.ne.s32.totalorder %s1789_s28, %s1472_s15  ;;  %p1477_p10 = scmp.lt.u32.totalorder %s1789_s28, %s1846_s9 }
 0x8f0   : > { %p1478_p11 = scmp.lt.u32.totalorder %s1476_s26, %s1472_s15  ;;  %p1480_p13 = scmp.lt.u32.totalorder %s1472_s15, %s1789_s28 }
 0x8f1   : > { %p1474_p7 = pnand %p1473_p6, %p1631_p4 }
 0x8f2   : > { %p1479_p12 = por %p1478_p11, %p1477_p10 }
 0x8f3   : > { %p1475_p9 = pneg %p1474_p7 }
 0x8f4   : > { %p1481_p0 = por %p1480_p13, %p1479_p12 }
 0x8f6   : > { %p1482_p1 = pnand %p1481_p0, %p1475_p9 }
 0x8f8   : > { %1485 = shalt.err (!%p1482_p1)
}
 0x8f9   : > { %1375 = dma.vmem_to_hbm [thread:$0]  (%p1631_p4), %s1791_s25, 128, %s1789_s28, %s1109_s29  }
 0x8fa PF: > { %p1381_p2 = scmp.ge.s32.totalorder %s1536_s14, 2  ;;  %s1135_s12 = sand.u32 1, %s1516_s30  }
 0x8fb   : > { %s1136_s18 = scalar_lea.sflag [#allocation3], %s1135_s12 }
 0x8fc   : > { %p1378_p3 = pnand %p1381_p2, %p1638_p8 }
 0x8fe   : > { %1511 = dma.done.wait (!%p1378_p3), %s1136_s18, 128  }
 0x8ff   : > { %1513 = vsyncadd (!%p1378_p3), %s1136_s18, 4294967168  ;;  %s22_s14 = sadd.s32 1, %s1536_s14   ;;  %s1849_s30 = smov %s1520_s10 }
 0x900   : > { %p19_p5 = scmp.ge.s32.totalorder %s22_s14, 4   ;;  %s1850_s10 = smov %s1524_s11 }
 0x901   : > { %s1851_s11 = smov %s1644_s22  ;;  %s1852_s12 = smov %s1532_s13 }
 0x902   : > { %s1853_s13 = smov %s1855_s17  ;;  %21 = sbr.rel (!%p19_p5) target bundleno = 4 (0x4), region = 98 }
 0x909   :  { %1141 = vsyncpa [#allocation3], 1 }
 0x90a   :  { %1143 = vsyncpa [#allocation3 + $0x1], 1 }

</bundles_post_ra>
